<compile_context>
chip_gen: v6e
topology: v6e:2x2x1
jax: 0.10.0
libtpu: 0.0.40
codegen_flags: <defaults>
</compile_context>

<pallas_src>
import functools
import math

import jax
import jax.numpy as jnp
from jax.experimental import pallas as pl
from jax.experimental.pallas import tpu as pltpu


def _bottleneck_kernel(x_ref, w1_ref, w2_ref, w3_ref,
                       b1_ref, b2_ref, b3_ref, mask_ref, o_ref, *, W):
    """One batch-block of Bottleneck (stride=1, no downsample).

    Layouts (L = nb * H * W for this grid step):
      x_ref   : (Cin,  L)  f32    channels on sublanes, batch*spatial on lanes
      w1_ref  : (Cmid, Cin)       bf16, BN1 scale folded in
      w2_ref  : (Cmid, 9*Cmid)    bf16, BN2 scale folded in, tap-major stacked
      w3_ref  : (Cout, Cmid)      bf16, BN3 scale folded in
      b*_ref  : (C, 1)     f32    folded BatchNorm bias columns
      mask_ref: (9, L)     f32    per-tap border-validity masks
      o_ref   : (Cout, L)
    """
    x = x_ref[...]                                    # (Cin, L) f32 (residual)
    x_b = x.astype(jnp.bfloat16)

    # conv1 (1x1) + BN1 + ReLU — one bf16 MXU matmul with N-dim = L.
    y1 = jnp.dot(w1_ref[...], x_b, preferred_element_type=jnp.float32)
    y1 = jnp.maximum(y1 + b1_ref[...], 0.0)           # (Cmid, L) f32

    # conv2 (3x3, stride=1, pad=1) + BN2 + ReLU:
    # nine lane-shifted taps, each multiplied by its precomputed border mask,
    # stacked along sublanes -> a single K = 9*Cmid MXU matmul.
    mask = mask_ref[...]                              # (9, L) f32
    taps = []
    k = 0
    for dh in (-1, 0, 1):
        for dw in (-1, 0, 1):
            off = dh * W + dw
            # tap[:, q] = y1[:, q + off]; out-of-image lanes are zeroed by the
            # mask, so the circular wrap never leaks across image/batch edges.
            t = y1 if off == 0 else jnp.roll(y1, shift=-off, axis=1)
            t = t * mask[k:k + 1, :]                  # f32 VPU (v5e-friendly)
            taps.append(t.astype(jnp.bfloat16))
            k += 1
    tap_stack = jnp.concatenate(taps, axis=0)         # (9*Cmid, L) bf16
    y2 = jnp.dot(w2_ref[...], tap_stack, preferred_element_type=jnp.float32)
    y2 = jnp.maximum(y2 + b2_ref[...], 0.0)           # (Cmid, L) f32

    # conv3 (1x1) + BN3, residual add (downsample=None => residual = x), ReLU.
    y3 = jnp.dot(w3_ref[...], y2.astype(jnp.bfloat16),
                 preferred_element_type=jnp.float32)
    y3 = y3 + b3_ref[...]                             # (Cout, L) f32
    o_ref[...] = jnp.maximum(y3 + x, 0.0).astype(o_ref.dtype)


def _fold_bn(gamma, beta, mean, var, eps=1e-5):
    scale = gamma / jnp.sqrt(var + eps)
    bias = beta - mean * scale
    return scale, bias


def bottleneck_forward(x_nchw, w1, w2, w3, bn1, bn2, bn3, *, eps=1e-5):
    """Pallas forward of Bottleneck(inplanes, planes), stride=1, downsample=None.

    x_nchw: (N, Cin, H, W)
    w1: (Cmid, Cin, 1, 1)  w2: (Cmid, Cmid, 3, 3)  w3: (Cout, Cmid, 1, 1)  (torch OIHW)
    bn*: (gamma, beta, running_mean, running_var) per BatchNorm layer.
    """
    N, Cin, H, W = x_nchw.shape
    Cmid = w1.shape[0]
    Cout = w3.shape[0]
    assert Cout == Cin, "downsample=None requires inplanes == planes * expansion"
    HW = H * W

    s1, b1 = _fold_bn(*bn1, eps=eps)
    s2, b2 = _fold_bn(*bn2, eps=eps)
    s3, b3 = _fold_bn(*bn3, eps=eps)

    # Fold BN scale into conv weights (per output channel), cast to bf16 (MXU).
    w1_k = (w1.reshape(Cmid, Cin) * s1[:, None]).astype(jnp.bfloat16)
    w2_f = w2 * s2[:, None, None, None]                              # OIHW
    # Tap-major stacked layout: column k*Cmid + i holds w2[o, i, kh, kw] with
    # k = kh*3 + kw — matches the tap stacking order inside the kernel.
    w2_k = jnp.transpose(w2_f, (0, 2, 3, 1)).reshape(Cmid, 9 * Cmid)
    w2_k = w2_k.astype(jnp.bfloat16)
    w3_k = (w3.reshape(Cout, Cmid) * s3[:, None]).astype(jnp.bfloat16)
    col = lambda v: v.reshape(-1, 1).astype(jnp.float32)

    # Activations as (C, N*H*W): channels -> sublanes, batch*spatial -> lanes.
    # x stays f32 so the residual add is exact; it is cast to bf16 in-kernel
    # only for the conv1 matmul.  (Feed bf16 here to halve activation DMA in
    # bandwidth-bound deployments.)
    x2 = jnp.transpose(x_nchw.reshape(N, Cin, HW), (1, 0, 2)).reshape(Cin, N * HW)

    # Batch block per grid step.  Working set ~ 5.6x the x block (double
    # buffered in/out + y1/tap-stack/y2), so a 4 MiB x-block cap stays inside
    # the 32 MiB scoped VMEM we request below on all generations (v7x has only
    # 64 MiB physical per TensorCore).  Keep >= 2 grid steps when N >= 2 so
    # the "parallel" batch axis can be split across cores.
    per_batch = Cin * HW * 4
    x_block_cap = 4 * 1024 * 1024
    max_nb = max(1, N // 2) if N > 1 else 1
    nb = 1
    for d in range(1, max_nb + 1):
        if N % d == 0 and d * per_batch <= x_block_cap:
            nb = d
    L = nb * HW
    # TODO(synk): pad the flattened spatial axis (and the masks) to a multiple
    #             of 128 lanes for stages like ResNet's 7x7 / 14x14 maps.
    assert L % 128 == 0, "lane dim (nb*H*W) must be a multiple of 128"

    # Precomputed 3x3 border-validity masks (grid-step invariant), one row per
    # tap in k = (dh+1)*3 + (dw+1) order, tiled across the nb images per block.
    pp = jnp.arange(HW)
    hh, ww = pp // W, pp % W
    rows = []
    for dh in (-1, 0, 1):
        for dw in (-1, 0, 1):
            rows.append((hh + dh >= 0) & (hh + dh < H) &
                        (ww + dw >= 0) & (ww + dw < W))
    mask = jnp.tile(jnp.stack(rows).astype(jnp.float32), (1, nb))    # (9, L)

    kernel = functools.partial(_bottleneck_kernel, W=W)
    const2 = lambda b: (0, 0)
    out2 = pl.pallas_call(
        kernel,
        out_shape=jax.ShapeDtypeStruct((Cout, N * HW), x_nchw.dtype),
        grid_spec=pltpu.PrefetchScalarGridSpec(
            num_scalar_prefetch=0,
            grid=(N // nb,),
            in_specs=[
                pl.BlockSpec((Cin, L), lambda b: (0, b)),        # activations
                pl.BlockSpec((Cmid, Cin), const2),               # conv1*s1 (bf16)
                pl.BlockSpec((Cmid, 9 * Cmid), const2),          # conv2*s2 stacked
                pl.BlockSpec((Cout, Cmid), const2),              # conv3*s3 (bf16)
                pl.BlockSpec((Cmid, 1), const2),                 # bn1 bias
                pl.BlockSpec((Cmid, 1), const2),                 # bn2 bias
                pl.BlockSpec((Cout, 1), const2),                 # bn3 bias
                pl.BlockSpec((9, L), const2),                    # tap masks
            ],
            out_specs=pl.BlockSpec((Cout, L), lambda b: (0, b)),
        ),
        compiler_params=pltpu.CompilerParams(
            dimension_semantics=("parallel",),
            vmem_limit_bytes=32 * 1024 * 1024,
        ),
    )(x2, w1_k, w2_k, w3_k, col(b1), col(b2), col(b3), mask)

    return jnp.transpose(out2.reshape(Cout, N, HW), (1, 0, 2)).reshape(N, Cout, H, W)


def bottleneck_ref(x, w1, w2, w3, bn1, bn2, bn3, eps=1e-5):
    """Pure-JAX reference mirroring the PyTorch forward (eval-mode BN)."""
    def conv(inp, wt, pad):
        return jax.lax.conv_general_dilated(
            inp, wt, window_strides=(1, 1), padding=((pad, pad), (pad, pad)),
            dimension_numbers=("NCHW", "OIHW", "NCHW"),
            precision=jax.lax.Precision.HIGHEST)

    def bn(inp, params):
        g, b, m, v = (t[None, :, None, None] for t in params)
        return (inp - m) / jnp.sqrt(v + eps) * g + b

    out = jax.nn.relu(bn(conv(x, w1, 0), bn1))
    out = jax.nn.relu(bn(conv(out, w2, 1), bn2))
    out = bn(conv(out, w3, 0), bn3)
    return jax.nn.relu(out + x)          # downsample is None => residual = x


if __name__ == "__main__":
    key = jax.random.PRNGKey(0)
    ks = jax.random.split(key, 8)

    # Bottleneck(inplanes=64, planes=16): stride=1, downsample=None requires
    # inplanes == planes * expansion (= 4). Small, module-consistent shapes.
    N, planes, H, W = 2, 16, 16, 16
    Cmid = planes
    Cin = Cout = planes * 4

    x = jax.random.normal(ks[0], (N, Cin, H, W), dtype=jnp.float32)
    w1 = jax.random.normal(ks[1], (Cmid, Cin, 1, 1), jnp.float32) / math.sqrt(Cin)
    w2 = jax.random.normal(ks[2], (Cmid, Cmid, 3, 3), jnp.float32) / math.sqrt(Cmid * 9)
    w3 = jax.random.normal(ks[3], (Cout, Cmid, 1, 1), jnp.float32) / math.sqrt(Cmid)

    def bn_params(k, c):
        k1, k2, k3, k4 = jax.random.split(k, 4)
        gamma = 0.5 + 0.5 * jnp.abs(jax.random.normal(k1, (c,), jnp.float32))
        beta = 0.1 * jax.random.normal(k2, (c,), jnp.float32)
        mean = 0.1 * jax.random.normal(k3, (c,), jnp.float32)
        var = 0.5 + 0.5 * jnp.abs(jax.random.normal(k4, (c,), jnp.float32))
        return gamma, beta, mean, var

    bn1 = bn_params(ks[4], Cmid)
    bn2 = bn_params(ks[5], Cmid)
    bn3 = bn_params(ks[6], Cout)

    out = bottleneck_forward(x, w1, w2, w3, bn1, bn2, bn3)
    out = jax.block_until_ready(out)

    ref = bottleneck_ref(x, w1, w2, w3, bn1, bn2, bn3)
    assert out.shape == (N, Cout, H, W), out.shape
    err = float(jnp.max(jnp.abs(out - ref)))
    # bf16 MXU operands (per the perf review) give O(1e-2) rounding error over
    # three stacked convs vs the f32 HIGHEST-precision reference; structural
    # bugs (wrong tap / mask / BN fold / residual) produce O(1) errors.
    assert err < 1e-1, f"max abs error vs reference: {err}"

    print("KERNEL_OK")
</pallas_src>

<mosaic_0001>
module attributes {stable_mosaic.version = 11 : i64} {
  func.func @_bottleneck_kernel(%arg0: i32, %arg1: memref<64x256xf32, #tpu.memory_space<vmem>>, %arg2: memref<16x64xbf16, #tpu.memory_space<vmem>>, %arg3: memref<16x144xbf16, #tpu.memory_space<vmem>>, %arg4: memref<64x16xbf16, #tpu.memory_space<vmem>>, %arg5: memref<16x1xf32, #tpu.memory_space<vmem>>, %arg6: memref<16x1xf32, #tpu.memory_space<vmem>>, %arg7: memref<64x1xf32, #tpu.memory_space<vmem>>, %arg8: memref<9x256xf32, #tpu.memory_space<vmem>>, %arg9: memref<64x256xf32, #tpu.memory_space<vmem>>) attributes {dimension_semantics = [#tpu.dimension_semantics<parallel>], iteration_bounds = array<i64: 2>, scalar_prefetch = 0 : i64, scratch_operands = 0 : i64, tpu.core_type = #tpu.core_type<tc>, window_params = [{transform_indices = @transform_0, window_bounds = array<i64: 64, 256>}, {pipeline_mode = #tpu.pipeline_mode<synchronous>, transform_indices = @transform_1, window_bounds = array<i64: 16, 64>}, {pipeline_mode = #tpu.pipeline_mode<synchronous>, transform_indices = @transform_2, window_bounds = array<i64: 16, 144>}, {pipeline_mode = #tpu.pipeline_mode<synchronous>, transform_indices = @transform_3, window_bounds = array<i64: 64, 16>}, {pipeline_mode = #tpu.pipeline_mode<synchronous>, transform_indices = @transform_4, window_bounds = array<i64: 16, 1>}, {pipeline_mode = #tpu.pipeline_mode<synchronous>, transform_indices = @transform_5, window_bounds = array<i64: 16, 1>}, {pipeline_mode = #tpu.pipeline_mode<synchronous>, transform_indices = @transform_6, window_bounds = array<i64: 64, 1>}, {pipeline_mode = #tpu.pipeline_mode<synchronous>, transform_indices = @transform_7, window_bounds = array<i64: 9, 256>}, {transform_indices = @transform_8, window_bounds = array<i64: 64, 256>}]} {
    %c0 = arith.constant 0 : index
    %c0_0 = arith.constant 0 : index
    %0 = vector.load %arg1[%c0, %c0_0] : memref<64x256xf32, #tpu.memory_space<vmem>>, vector<64x256xf32>
    %1 = arith.truncf %0 : vector<64x256xf32> to vector<64x256xbf16>
    %c0_1 = arith.constant 0 : index
    %c0_2 = arith.constant 0 : index
    %2 = vector.load %arg2[%c0_1, %c0_2] : memref<16x64xbf16, #tpu.memory_space<vmem>>, vector<16x64xbf16>
    %cst = arith.constant dense<0.000000e+00> : vector<16x256xf32>
    %3 = tpu.matmul %2, %1, %cst {dimension_numbers = #tpu.dot_dimension_numbers<[1], [0], [0], [1], [0, 0, 1, 1], [], []>} : vector<16x64xbf16>, vector<64x256xbf16>, vector<16x256xf32> -> vector<16x256xf32>
    %c0_3 = arith.constant 0 : index
    %c0_4 = arith.constant 0 : index
    %4 = vector.load %arg5[%c0_3, %c0_4] : memref<16x1xf32, #tpu.memory_space<vmem>>, vector<16x1xf32>
    %5 = vector.broadcast %4 : vector<16x1xf32> to vector<16x256xf32>
    %6 = arith.addf %3, %5 : vector<16x256xf32>
    %cst_5 = arith.constant 0.000000e+00 : f32
    %7 = vector.broadcast %cst_5 : f32 to vector<16x256xf32>
    %8 = arith.maximumf %6, %7 : vector<16x256xf32>
    %c0_6 = arith.constant 0 : index
    %c0_7 = arith.constant 0 : index
    %9 = vector.load %arg8[%c0_6, %c0_7] : memref<9x256xf32, #tpu.memory_space<vmem>>, vector<9x256xf32>
    %10 = vector.extract_strided_slice %8 {offsets = [0, 239], sizes = [16, 17], strides = [1, 1]} : vector<16x256xf32> to vector<16x17xf32>
    %11 = vector.extract_strided_slice %8 {offsets = [0, 0], sizes = [16, 239], strides = [1, 1]} : vector<16x256xf32> to vector<16x239xf32>
    %12 = tpu.concatenate %10, %11 in 1 : vector<16x17xf32>, vector<16x239xf32> -> vector<16x256xf32>
    %13 = vector.extract_strided_slice %9 {offsets = [0, 0], sizes = [1, 256], strides = [1, 1]} : vector<9x256xf32> to vector<1x256xf32>
    %14 = vector.broadcast %13 : vector<1x256xf32> to vector<16x256xf32>
    %15 = arith.mulf %12, %14 : vector<16x256xf32>
    %16 = arith.truncf %15 : vector<16x256xf32> to vector<16x256xbf16>
    %17 = vector.extract_strided_slice %8 {offsets = [0, 240], sizes = [16, 16], strides = [1, 1]} : vector<16x256xf32> to vector<16x16xf32>
    %18 = vector.extract_strided_slice %8 {offsets = [0, 0], sizes = [16, 240], strides = [1, 1]} : vector<16x256xf32> to vector<16x240xf32>
    %19 = tpu.concatenate %17, %18 in 1 : vector<16x16xf32>, vector<16x240xf32> -> vector<16x256xf32>
    %20 = vector.extract_strided_slice %9 {offsets = [1, 0], sizes = [1, 256], strides = [1, 1]} : vector<9x256xf32> to vector<1x256xf32>
    %21 = vector.broadcast %20 : vector<1x256xf32> to vector<16x256xf32>
    %22 = arith.mulf %19, %21 : vector<16x256xf32>
    %23 = arith.truncf %22 : vector<16x256xf32> to vector<16x256xbf16>
    %24 = vector.extract_strided_slice %8 {offsets = [0, 241], sizes = [16, 15], strides = [1, 1]} : vector<16x256xf32> to vector<16x15xf32>
    %25 = vector.extract_strided_slice %8 {offsets = [0, 0], sizes = [16, 241], strides = [1, 1]} : vector<16x256xf32> to vector<16x241xf32>
    %26 = tpu.concatenate %24, %25 in 1 : vector<16x15xf32>, vector<16x241xf32> -> vector<16x256xf32>
    %27 = vector.extract_strided_slice %9 {offsets = [2, 0], sizes = [1, 256], strides = [1, 1]} : vector<9x256xf32> to vector<1x256xf32>
    %28 = vector.broadcast %27 : vector<1x256xf32> to vector<16x256xf32>
    %29 = arith.mulf %26, %28 : vector<16x256xf32>
    %30 = arith.truncf %29 : vector<16x256xf32> to vector<16x256xbf16>
    %31 = vector.extract_strided_slice %8 {offsets = [0, 255], sizes = [16, 1], strides = [1, 1]} : vector<16x256xf32> to vector<16x1xf32>
    %32 = vector.extract_strided_slice %8 {offsets = [0, 0], sizes = [16, 255], strides = [1, 1]} : vector<16x256xf32> to vector<16x255xf32>
    %33 = tpu.concatenate %31, %32 in 1 : vector<16x1xf32>, vector<16x255xf32> -> vector<16x256xf32>
    %34 = vector.extract_strided_slice %9 {offsets = [3, 0], sizes = [1, 256], strides = [1, 1]} : vector<9x256xf32> to vector<1x256xf32>
    %35 = vector.broadcast %34 : vector<1x256xf32> to vector<16x256xf32>
    %36 = arith.mulf %33, %35 : vector<16x256xf32>
    %37 = arith.truncf %36 : vector<16x256xf32> to vector<16x256xbf16>
    %38 = vector.extract_strided_slice %9 {offsets = [4, 0], sizes = [1, 256], strides = [1, 1]} : vector<9x256xf32> to vector<1x256xf32>
    %39 = vector.broadcast %38 : vector<1x256xf32> to vector<16x256xf32>
    %40 = arith.mulf %8, %39 : vector<16x256xf32>
    %41 = arith.truncf %40 : vector<16x256xf32> to vector<16x256xbf16>
    %42 = vector.extract_strided_slice %8 {offsets = [0, 1], sizes = [16, 255], strides = [1, 1]} : vector<16x256xf32> to vector<16x255xf32>
    %43 = vector.extract_strided_slice %8 {offsets = [0, 0], sizes = [16, 1], strides = [1, 1]} : vector<16x256xf32> to vector<16x1xf32>
    %44 = tpu.concatenate %42, %43 in 1 : vector<16x255xf32>, vector<16x1xf32> -> vector<16x256xf32>
    %45 = vector.extract_strided_slice %9 {offsets = [5, 0], sizes = [1, 256], strides = [1, 1]} : vector<9x256xf32> to vector<1x256xf32>
    %46 = vector.broadcast %45 : vector<1x256xf32> to vector<16x256xf32>
    %47 = arith.mulf %44, %46 : vector<16x256xf32>
    %48 = arith.truncf %47 : vector<16x256xf32> to vector<16x256xbf16>
    %49 = vector.extract_strided_slice %8 {offsets = [0, 15], sizes = [16, 241], strides = [1, 1]} : vector<16x256xf32> to vector<16x241xf32>
    %50 = vector.extract_strided_slice %8 {offsets = [0, 0], sizes = [16, 15], strides = [1, 1]} : vector<16x256xf32> to vector<16x15xf32>
    %51 = tpu.concatenate %49, %50 in 1 : vector<16x241xf32>, vector<16x15xf32> -> vector<16x256xf32>
    %52 = vector.extract_strided_slice %9 {offsets = [6, 0], sizes = [1, 256], strides = [1, 1]} : vector<9x256xf32> to vector<1x256xf32>
    %53 = vector.broadcast %52 : vector<1x256xf32> to vector<16x256xf32>
    %54 = arith.mulf %51, %53 : vector<16x256xf32>
    %55 = arith.truncf %54 : vector<16x256xf32> to vector<16x256xbf16>
    %56 = vector.extract_strided_slice %8 {offsets = [0, 16], sizes = [16, 240], strides = [1, 1]} : vector<16x256xf32> to vector<16x240xf32>
    %57 = vector.extract_strided_slice %8 {offsets = [0, 0], sizes = [16, 16], strides = [1, 1]} : vector<16x256xf32> to vector<16x16xf32>
    %58 = tpu.concatenate %56, %57 in 1 : vector<16x240xf32>, vector<16x16xf32> -> vector<16x256xf32>
    %59 = vector.extract_strided_slice %9 {offsets = [7, 0], sizes = [1, 256], strides = [1, 1]} : vector<9x256xf32> to vector<1x256xf32>
    %60 = vector.broadcast %59 : vector<1x256xf32> to vector<16x256xf32>
    %61 = arith.mulf %58, %60 : vector<16x256xf32>
    %62 = arith.truncf %61 : vector<16x256xf32> to vector<16x256xbf16>
    %63 = vector.extract_strided_slice %8 {offsets = [0, 17], sizes = [16, 239], strides = [1, 1]} : vector<16x256xf32> to vector<16x239xf32>
    %64 = vector.extract_strided_slice %8 {offsets = [0, 0], sizes = [16, 17], strides = [1, 1]} : vector<16x256xf32> to vector<16x17xf32>
    %65 = tpu.concatenate %63, %64 in 1 : vector<16x239xf32>, vector<16x17xf32> -> vector<16x256xf32>
    %66 = vector.extract_strided_slice %9 {offsets = [8, 0], sizes = [1, 256], strides = [1, 1]} : vector<9x256xf32> to vector<1x256xf32>
    %67 = vector.broadcast %66 : vector<1x256xf32> to vector<16x256xf32>
    %68 = arith.mulf %65, %67 : vector<16x256xf32>
    %69 = arith.truncf %68 : vector<16x256xf32> to vector<16x256xbf16>
    %70 = tpu.concatenate %16, %23, %30, %37, %41, %48, %55, %62, %69 in 0 : vector<16x256xbf16>, vector<16x256xbf16>, vector<16x256xbf16>, vector<16x256xbf16>, vector<16x256xbf16>, vector<16x256xbf16>, vector<16x256xbf16>, vector<16x256xbf16>, vector<16x256xbf16> -> vector<144x256xbf16>
    %c0_8 = arith.constant 0 : index
    %c0_9 = arith.constant 0 : index
    %71 = vector.load %arg3[%c0_8, %c0_9] : memref<16x144xbf16, #tpu.memory_space<vmem>>, vector<16x144xbf16>
    %cst_10 = arith.constant dense<0.000000e+00> : vector<16x256xf32>
    %72 = tpu.matmul %71, %70, %cst_10 {dimension_numbers = #tpu.dot_dimension_numbers<[1], [0], [0], [1], [0, 0, 1, 1], [], []>} : vector<16x144xbf16>, vector<144x256xbf16>, vector<16x256xf32> -> vector<16x256xf32>
    %c0_11 = arith.constant 0 : index
    %c0_12 = arith.constant 0 : index
    %73 = vector.load %arg6[%c0_11, %c0_12] : memref<16x1xf32, #tpu.memory_space<vmem>>, vector<16x1xf32>
    %74 = vector.broadcast %73 : vector<16x1xf32> to vector<16x256xf32>
    %75 = arith.addf %72, %74 : vector<16x256xf32>
    %cst_13 = arith.constant 0.000000e+00 : f32
    %76 = vector.broadcast %cst_13 : f32 to vector<16x256xf32>
    %77 = arith.maximumf %75, %76 : vector<16x256xf32>
    %c0_14 = arith.constant 0 : index
    %c0_15 = arith.constant 0 : index
    %78 = vector.load %arg4[%c0_14, %c0_15] : memref<64x16xbf16, #tpu.memory_space<vmem>>, vector<64x16xbf16>
    %79 = arith.truncf %77 : vector<16x256xf32> to vector<16x256xbf16>
    %cst_16 = arith.constant dense<0.000000e+00> : vector<64x256xf32>
    %80 = tpu.matmul %78, %79, %cst_16 {dimension_numbers = #tpu.dot_dimension_numbers<[1], [0], [0], [1], [0, 0, 1, 1], [], []>} : vector<64x16xbf16>, vector<16x256xbf16>, vector<64x256xf32> -> vector<64x256xf32>
    %c0_17 = arith.constant 0 : index
    %c0_18 = arith.constant 0 : index
    %81 = vector.load %arg7[%c0_17, %c0_18] : memref<64x1xf32, #tpu.memory_space<vmem>>, vector<64x1xf32>
    %82 = vector.broadcast %81 : vector<64x1xf32> to vector<64x256xf32>
    %83 = arith.addf %80, %82 : vector<64x256xf32>
    %84 = arith.addf %83, %0 : vector<64x256xf32>
    %cst_19 = arith.constant 0.000000e+00 : f32
    %85 = vector.broadcast %cst_19 : f32 to vector<64x256xf32>
    %86 = arith.maximumf %84, %85 : vector<64x256xf32>
    %c0_20 = arith.constant 0 : index
    %c0_21 = arith.constant 0 : index
    %87 = vector.load %arg9[%c0_20, %c0_21] : memref<64x256xf32, #tpu.memory_space<vmem>>, vector<64x256xf32>
    tpu.vector_store %arg9[%c0_20, %c0_21], %86 {strides = array<i32>} : memref<64x256xf32, #tpu.memory_space<vmem>>, vector<64x256xf32>,
    return
  }
  func.func @transform_0(%arg0: i32) -> (i32, i32) {
    %c0_i32 = arith.constant 0 : i32
    %c0_i32_0 = arith.constant 0 : i32
    return %c0_i32, %arg0 : i32, i32
  }
  func.func @transform_1(%arg0: i32) -> (i32, i32) {
    %c0_i32 = arith.constant 0 : i32
    %c0_i32_0 = arith.constant 0 : i32
    %c0_i32_1 = arith.constant 0 : i32
    return %c0_i32, %c0_i32_0 : i32, i32
  }
  func.func @transform_2(%arg0: i32) -> (i32, i32) {
    %c0_i32 = arith.constant 0 : i32
    %c0_i32_0 = arith.constant 0 : i32
    %c0_i32_1 = arith.constant 0 : i32
    return %c0_i32, %c0_i32_0 : i32, i32
  }
  func.func @transform_3(%arg0: i32) -> (i32, i32) {
    %c0_i32 = arith.constant 0 : i32
    %c0_i32_0 = arith.constant 0 : i32
    %c0_i32_1 = arith.constant 0 : i32
    return %c0_i32, %c0_i32_0 : i32, i32
  }
  func.func @transform_4(%arg0: i32) -> (i32, i32) {
    %c0_i32 = arith.constant 0 : i32
    %c0_i32_0 = arith.constant 0 : i32
    %c0_i32_1 = arith.constant 0 : i32
    return %c0_i32, %c0_i32_0 : i32, i32
  }
  func.func @transform_5(%arg0: i32) -> (i32, i32) {
    %c0_i32 = arith.constant 0 : i32
    %c0_i32_0 = arith.constant 0 : i32
    %c0_i32_1 = arith.constant 0 : i32
    return %c0_i32, %c0_i32_0 : i32, i32
  }
  func.func @transform_6(%arg0: i32) -> (i32, i32) {
    %c0_i32 = arith.constant 0 : i32
    %c0_i32_0 = arith.constant 0 : i32
    %c0_i32_1 = arith.constant 0 : i32
    return %c0_i32, %c0_i32_0 : i32, i32
  }
  func.func @transform_7(%arg0: i32) -> (i32, i32) {
    %c0_i32 = arith.constant 0 : i32
    %c0_i32_0 = arith.constant 0 : i32
    %c0_i32_1 = arith.constant 0 : i32
    return %c0_i32, %c0_i32_0 : i32, i32
  }
  func.func @transform_8(%arg0: i32) -> (i32, i32) {
    %c0_i32 = arith.constant 0 : i32
    %c0_i32_0 = arith.constant 0 : i32
    return %c0_i32, %arg0 : i32, i32
  }
}

</mosaic_0001>

<bundles_post_ra>
// kernel: tpu_custom_call.1
= control target key start
LH: loop header
LB: loop body
LE: loop exit
PB: predicated region body
PF: predicated region fallthrough
CT: control target
= control target key end

     0   :  { %13 = vsyncpa [#allocation3], 0  ;;  %s1809_s0 = inlined_call_operand.hbm [shape: f32[64,512], index: 0, kind: input, shape index: {}]   ;;  %s1810_s1 = inlined_call_operand.vmem [shape: bf16[16,64], index: 1, kind: input, shape index: {}]   ;;  %s1811_s2 = inlined_call_operand.vmem [shape: bf16[16,144], index: 2, kind: input, shape index: {}]   ;;  %s1812_s3 = inlined_call_operand.vmem [shape: bf16[64,16], index: 3, kind: input, shape index: {}]   ;;  %s1813_s4 = inlined_call_operand.vmem [shape: f32[16,1], index: 4, kind: input, shape index: {}]   ;;  %s1814_s5 = inlined_call_operand.vmem [shape: f32[16,1], index: 5, kind: input, shape index: {}]   ;;  %s1815_s6 = inlined_call_operand.vmem [shape: f32[64,1], index: 6, kind: input, shape index: {}]   ;;  %s1816_s7 = inlined_call_operand.vmem [shape: f32[9,256], index: 7, kind: input, shape index: {}]   ;;  %s1817_s8 = inlined_call_operand.hbm [shape: f32[64,512], index: 8, kind: output, shape index: {}]  }
   0x1   :  { %15 = vsyncpa [#allocation3 + $0x1], 0 }
   0x2   :  { %16 = vsyncpa [#allocation4], 0 }
   0x3   :  { %18 = vsyncpa [#allocation4 + $0x1], 0  ;;  %s1334_s27 = smov 0   ;;  %s1336_s28 = smov 0  }
   0x4   :  { %s1338_s29 = smov 0   ;;  %s1340_s30 = smov 0  }
   0x5 LB: > { %s1355_s9 = sadd.s32 4294967295, %s1271_s30   ;;  %s1078_s10 = sadd.s32 4294967294, %s1271_s30   ;;  %s1271_s30 = sphi %s1340_s30, %s1835_s30   ;;  %s1267_s29 = sphi %s1338_s29, %s1834_s29   ;;  %s1263_s28 = sphi %s1336_s28, %s1833_s28   ;;  %s1259_s27 = sphi %s1334_s27, %s1832_s27  }
   0x6   : > { %s1359_s11 = sadd.s32 1, %s1271_s30   ;;  %s31_s12 = sadd.s32 1, %s1267_s29 }
   0x7   : > { %s28_s13 = ssub.s32 %s1271_s30, %s1359_s11  ;;  %p38_p0 = scmp.ne.s32.totalorder %s1267_s29, %s1263_s28 }
   0x8   : > { %p29_p1 = scmp.eq.s32.totalorder %s28_s13, 0  ;;  %p39_p2 = scmp.eq.s32.totalorder %s1271_s30, 0 }
   0x9   : > { %p44_p3 = scmp.ne.s32.totalorder %s1263_s28, %s1259_s27  ;;  %p45_p4 = scmp.eq.s32.totalorder %s1355_s9, 0 }
   0xa   : > { %s1371_s14 = scalar_select %p29_p1, %s1267_s29, %s31_s12  }
   0xb   : > { %p1373_p5 = por %p39_p2, %p38_p0  ;;  %p1377_p6 = por %p45_p4, %p44_p3 }
   0xc   : > { %1820 = sst [smem:[#allocation8_spill]] %s1371_s14  ;;  %p215_p7 = scmp.eq.s32.totalorder %s1355_s9, 1 }
   0xd   : > { %s1822_s16 = scalar_select %p1377_p6, 1, 0 }
   0xe   : > { %p221_p8 = scmp.eq.s32.totalorder %s1078_s10, 1  ;;  %p1121_p10 = scmp.lt.s32.totalorder %s1271_s30, 2 }
   0xf   : > { %p1384_p11 = por %p215_p7, %p38_p0  ;;  %s262_s19 = sand.u32 1, %s1267_s29  }
  0x10   : > { %p1388_p12 = por %p221_p8, %p44_p3  ;;  %s1107_s20 = sshll.u32 %s1271_s30, 8 }
  0x11   : > { %s1823_s17 = scalar_select %p1384_p11, 1, 0 }
  0x12   : > { %s1824_s18 = scalar_select %p1388_p12, 1, 0 }
  0x13   : > { %s1081_s21 = sshll.u32 %s262_s19, 7  ;;  %s1397_s24 = scalar_lea.hbm %s1809_s0, %s1107_s20 }
  0x14   : > { %s266_s25 = scalar_lea.vmem [#allocation2], %s1081_s21  ;;  %p1401_p13 = pnand %p1121_p10, %p1373_p5 }
  0x15   : > { %s273_s26 = sshll.u32 %s266_s25, 4  ;;  %s1408_s12 = scalar_lea.sflag [#allocation3], %s262_s19  ;;  %s1405_s26 = int_to_ptr.vmem [resolvable:$true] %s273_s26 }
  0x16   : > { %s1179_s13 = scalar_lea.hbm %s1397_s24, 2048  ;;  %p1181_p2 = pneg %p1401_p13 }
  0x17   : > { %p1180_p1 = scmp.ne.s32.totalorder %s1397_s24, %s1179_s13  ;;  %s1184_s15 = scalar_lea.hbm %s1809_s0, 4096 }
  0x18   : > { %p1185_p5 = scmp.lt.s32.totalorder %s1397_s24, %s1809_s0  ;;  %p1186_p7 = scmp.lt.s32.totalorder %s1184_s15, %s1179_s13 }
  0x19   : > { %p1182_p3 = pnand %p1181_p2, %p1180_p1 }
  0x1a   : > { %p1187_p8 = por %p1186_p7, %p1185_p5 }
  0x1b   : > { %p1183_p4 = pneg %p1182_p3 }
  0x1d   : > { %p1188_p10 = pnand %p1187_p8, %p1183_p4 }
  0x1f   : > { %1191 = shalt.err (!%p1188_p10)
}
  0x20   : > { %s1192_s19 = scalar_lea.vmem %s1405_s26, 2048  ;;  %s1273_s25 = smov [#allocation2]  }
  0x21   : > { %p1193_p9 = scmp.ne.s32.totalorder %s1405_s26, %s1192_s19  ;;  %s1197_s14 = sshll.u32 %s1273_s25, 4  ;;  %s1198_s14 = int_to_ptr.vmem [resolvable:$false] %s1197_s14 }
  0x22   : > { %s1199_s20 = scalar_lea.vmem %s1198_s14, 4096  ;;  %p1200_p3 = scmp.lt.s32.totalorder %s1405_s26, %s1198_s14 }
  0x23   : > { %p1195_p0 = pnand %p1193_p9, %p1181_p2  ;;  %p1201_p12 = scmp.lt.s32.totalorder %s1199_s20, %s1192_s19 }
  0x25   : > { %p1196_p1 = pneg %p1195_p0  ;;  %p1202_p11 = por %p1201_p12, %p1200_p3 }
  0x27   : > { %p1203_p6 = pnand %p1202_p11, %p1196_p1 }
  0x29   : > { %1206 = shalt.err (!%p1203_p6)
}
  0x2a   : > { %s1274_s13 = smov 512   ;;  %s1275_s21 = smov 256  }
  0x2b   : > { %s1276_s15 = smov 16   ;;  %p281_p9 = scmp.lt.s32.totalorder %s1271_s30, 3 }
  0x2c   : > { %1116 = dma.hbm_to_vmem [thread:$0]  (!%p1401_p13), %s1397_s24, 2048, %s1405_s26, %s1408_s12, %s1274_s13, %s1275_s21, %s1276_s15  }
  0x2d   : > { %p1826_p0 = scmp.ge.s32.totalorder %s1271_s30, 1 }
  0x2f   : > { %p282_p2 = pnand %p1826_p0, %p281_p9 }
  0x30   : > { %s1433_s14 = sand.u32 (!%p282_p2), 1, %s1263_s28   ;;  %p1827_p6 = scmp.ne.s32.totalorder (!%p282_p2), %s1822_s16, 0 }
  0x31   : > { %285 = sbr.rel (%p282_p2) target bundleno = 911 (0x38f), region = 52  ;;  %s1085_s22 = sshll.u32 (!%p282_p2), %s1433_s14, 7 }
  0x32   : > { %s288_s23 = scalar_lea.sflag (!%p282_p2), [#allocation3], %s1433_s14  ;;  %s1439_s19 = scalar_lea.vmem (!%p282_p2), [#allocation2], %s1085_s22 }
  0x36   : > { %1250 = dma.done.wait (%p1827_p6), %s288_s23, 2048  }
  0x37   : > { %1252 = vsyncadd (%p1827_p6), %s288_s23, 4294965248  ;;  %v1277_v0 = vmov 0   ;;  %v1449_v1 = vld [vmem:[%s1439_s19 + $0x68] sm:$0xff]  ;;  %v1452_v2 = vld [vmem:[%s1439_s19 + $0x78] sm:$0xff]  ;;  %vm370_vm0 = vcmask 523264   ;;  %v448_v28 = vlaneseq  ;;  %s1278_s23 = smov 113  }
  0x38   : > { %406 = vmatprep.mubr.bf16.mxu0 %v1277_v0  ;;  %1169 = vset.pattern.permute.xlu0 %v1277_v0  ;;  %v1455_v3 = vld [vmem:[%s1439_s19 + $0x60] sm:$0xff]  ;;  %v350_v4 = vpack.c.bf16 %v1452_v2, %v1449_v1  ;;  %v1460_v5 = vld [vmem:[%s1439_s19 + $0x70] sm:$0xff]  ;;  %v1463_v6 = vld [vmem:[%s1439_s19 + $0x48] sm:$0xff]  ;;  %s1280_s16 = smov 127   ;;  %s1281_s24 = smov 1   ;;  %vm472_vm1 = vcmask 130048  }
  0x39   : > { %1170 = vset.pattern.permute.xlu1 %v1277_v0  ;;  %v1466_v7 = vld [vmem:[%s1439_s19 + $0x58] sm:$0xff]  ;;  %v349_v8 = vpack.c.bf16 %v1460_v5, %v1455_v3  ;;  %v1473_v10 = vld [vmem:[%s1439_s19 + $0x40] sm:$0xff]  ;;  %v1476_v11 = vld [vmem:[%s1439_s19 + $0x50] sm:$0xff]  ;;  %v1522_v29 = vshrl.u32 %v448_v28, 7  ;;  %s1282_s26 = smov 15   ;;  %s1283_s10 = smov 16  }
  0x3a   : > { %v348_v9 = vpack.c.bf16 %v1466_v7, %v1463_v6  ;;  %v1479_v12 = vld [vmem:[%s1439_s19 + $0x28] sm:$0xff]  ;;  %382 = vmatprep.subr.bf16.mxu0 %v350_v4  ;;  %v1482_v13 = vld [vmem:[%s1439_s19 + $0x38] sm:$0xff]  ;;  %v347_v14 = vpack.c.bf16 %v1476_v11, %v1473_v10  ;;  %v1487_v15 = vld [vmem:[%s1439_s19 + $0x20] sm:$0xff]  ;;  %s1284_s12 = smov 17   ;;  %s1285_s25 = smov 111   ;;  %vm649_vm2 = vcmask 916480  }
  0x3b   : > { %383 = vmatpush1.bf16.msra.mxu0 %v349_v8  ;;  %v1490_v16 = vld [vmem:[%s1439_s19 + $0x30] sm:$0xff]  ;;  %v346_v17 = vpack.c.bf16 %v1482_v13, %v1479_v12  ;;  %v1495_v18 = vld [vmem:[%s1439_s19 + $0x8] sm:$0xff]  ;;  %v1498_v19 = vld [vmem:[%s1439_s19 + $0x18] sm:$0xff]  ;;  %v563_v33 = vsub.s32 4, %v1522_v29  ;;  %vm616_vm3 = vcmask 924672   ;;  %vm583_vm4 = vcmask 1039360  }
  0x3c   : > { %384 = vmatprep.subr.bf16.mxu0 %v348_v9  ;;  %v353_v20 = vld [vmem:[%s1813_s4] sm:$0xff]  ;;  %v354_v21 = vld [vmem:[%s1813_s4 + $0x8] sm:$0xff]  ;;  %v1510_v23 = vld [vmem:[%s1439_s19 + $0x10] sm:$0xff]  ;;  %v345_v24 = vpack.c.bf16 %v1490_v16, %v1487_v15  ;;  %v344_v25 = vpack.c.bf16 %v1498_v19, %v1495_v18  ;;  %vm538_vm5 = vcmask 7168   ;;  %vm505_vm6 = vcmask 121856   ;;  %p1828_p12 = scmp.ne.s32.totalorder %s1823_s17, 0 }
  0x3d   : > { %v1507_v22 = vld [vmem:[%s1439_s19] sm:$0xff]  ;;  %357 = vperm.xlu0 %1169, %v353_v20   ;;  %v1533_v40 = vld [vmem:[%s1816_s7 + $0x8] sm:$0xff]  ;;  %s1279_s19 = smov 112   ;;  %v792_v58 = vld [vmem:[%s1815_s6 + $0x10] sm:$0xff]  ;;  %vm439_vm7 = vcmask 138240   ;;  %vm682_vm8 = vcmask 908288  }
  0x3e   : > { %v343_v26 = vpack.c.bf16 %v1510_v23, %v1507_v22  ;;  %v1171_v27 = vld [vmem:[%s1810_s1] sm:$0xff]   ;;  %v568_v47 = vrot.slane %v1533_v40, %v563_v33  ;;  %v710_v60 = vld [vmem:[%s1814_s5 + $0x8] sm:$0xff]  ;;  %v796_v61 = vld [vmem:[%s1815_s6 + $0x30] sm:$0xff]  ;;  %s1286_s20 = smov [#allocation5]  }
  0x3f   : > { %385 = vmatpush1.bf16.msra.mxu0 %v347_v14  ;;  %v1528_v35 = vld [vmem:[%s1816_s7] sm:$0xff]  ;;  %v791_v62 = vld [vmem:[%s1815_s6 + $0x8] sm:$0xff]  ;;  %v793_v63 = vld [vmem:[%s1815_s6 + $0x18] sm:$0xff]  ;;  %s1211_s13 = sshll.u32 %s1286_s20, 4  ;;  %s1212_s13 = int_to_ptr.vmem [resolvable:$false] %s1211_s13 }
  0x40   : > { %386 = vmatprep.subr.bf16.mxu0 %v346_v17  ;;  %v564_v42 = vrot.slane %v1528_v35, %v563_v33  ;;  %v709_v55 = vld [vmem:[%s1814_s5] sm:$0xff]  ;;  %v795_v4 = vld [vmem:[%s1815_s6 + $0x28] sm:$0xff]  ;;  %v797_v8 = vld [vmem:[%s1815_s6 + $0x38] sm:$0xff]  ;;  %s1213_s21 = scalar_lea.vmem %s1212_s13, 4096 }
  0x41   : > { %362 = vperm.xlu0 %1169, %v354_v21   ;;  %v1174_v56 = vld [vmem:[%s1811_s2 + $0x4] ss:$8 sps:$4 sm:$0xff]  }
  0x42   : > { %1093 = vmatprep.mubr.msk.bf16.mxu1 %vm472_vm1, %v1174_v56  ;;  %v790_v57 = vld [vmem:[%s1815_s6] sm:$0xff] }
  0x43   : > { %387 = vmatpush1.bf16.msra.mxu0 %v345_v24  ;;  %v794_v59 = vld [vmem:[%s1815_s6 + $0x20] sm:$0xff] }
  0x44   : > { %388 = vmatprep.subr.bf16.mxu0 %v344_v25 }
  0x47   : > { %389 = vmatpush1.bf16.msra.mxu0 %v343_v26 }
  0x4a   : > { %1088 = vmatmul.mubr.msk.bf16.vlgmr.msra.gmra.mxu0 %vm370_vm0, %v1171_v27 }
  0x4b   : > { %902 = vmatprep.mubr.bf16.mxu0 %v1277_v0 }
  0xb8   : > { %v358_v30 = vpop.permute.xlu0 %357 }
  0xbc   : > { %v363_v38 = vpop.permute.xlu0 %362 }
 0x10a   : > { %v408_v31 = vpop.f32.mrf.mxu0 }
 0x10b   : > { %v409_v32 = vadd.f32 %v408_v31, %v358_v30 }
 0x10c   : > { %v410_v34 = vpop.f32.mrf.mxu0 }
 0x10d   : > { %v417_v36 = vmax.f32 %v409_v32, 0.0  ;;  %v411_v37 = vadd.f32 %v410_v34, %v358_v30  ;;  %v662_v34 = vsub.s32 7, %v1522_v29 }
 0x10e   : > { %v412_v39 = vpop.f32.mrf.mxu0 }
 0x10f   : > { %v413_v41 = vadd.f32 %v412_v39, %v363_v38  ;;  %608 = vrot.lane.b32.xlu0 %v417_v36, %s1278_s23  ;;  %641 = vrot.lane.b32.xlu1 %v417_v36, %s1279_s19  ;;  %v418_v44 = vmax.f32 %v411_v37, 0.0  ;;  %v1541_v49 = vmul.f32 %v564_v42, %v417_v36  ;;  %v663_v39 = vrot.slane %v1528_v35, %v662_v34 }
 0x110   : > { %v414_v43 = vpop.f32.mrf.mxu0 }
 0x111   : > { %v419_v45 = vmax.f32 %v413_v41, 0.0  ;;  %v415_v46 = vadd.f32 %v414_v43, %v363_v38  ;;  %v1545_v51 = vmul.f32 %v568_v47, %v418_v44  ;;  %v667_v41 = vrot.slane %v1533_v40, %v662_v34 }
 0x113   : > { %v420_v48 = vmax.f32 %v415_v46, 0.0  ;;  %575 = vrot.lane.b32.xlu0 %v417_v36, %s1280_s16  ;;  %643 = vrot.lane.b32.xlu1 %v418_v44, %s1279_s19  ;;  %v1543_v50 = vmul.f32 %v564_v42, %v419_v45 }
 0x115   : > { %v1547_v52 = vmul.f32 %v568_v47, %v420_v48  ;;  %v573_v53 = vpack.c.bf16 %v1543_v50, %v1541_v49 }
 0x117   : > { %534 = vrot.lane.b32.xlu0 %v417_v36, %s1281_s24  ;;  %610 = vrot.lane.b32.xlu1 %v418_v44, %s1278_s23  ;;  %v574_v54 = vpack.c.bf16 %v1547_v52, %v1545_v51 }
 0x11b   : > { %501 = vrot.lane.b32.xlu0 %v417_v36, %s1282_s26  ;;  %577 = vrot.lane.b32.xlu1 %v418_v44, %s1280_s16 }
 0x11f   : > { %528 = vrot.lane.b32.xlu0 %v418_v44, %s1281_s24  ;;  %536 = vrot.lane.b32.xlu1 %v419_v45, %s1281_s24 }
 0x123   : > { %495 = vrot.lane.b32.xlu0 %v418_v44, %s1282_s26  ;;  %503 = vrot.lane.b32.xlu1 %v419_v45, %s1282_s26 }
 0x127   : > { %645 = vrot.lane.b32.xlu0 %v419_v45, %s1279_s19  ;;  %470 = vrot.lane.b32.xlu1 %v419_v45, %s1283_s10 }
 0x12b   : > { %612 = vrot.lane.b32.xlu0 %v419_v45, %s1278_s23  ;;  %437 = vrot.lane.b32.xlu1 %v419_v45, %s1284_s12 }
 0x12f   : > { %579 = vrot.lane.b32.xlu0 %v419_v45, %s1280_s16  ;;  %647 = vrot.lane.b32.xlu1 %v420_v48, %s1279_s19 }
 0x133   : > { %462 = vrot.lane.b32.xlu0 %v418_v44, %s1283_s10  ;;  %614 = vrot.lane.b32.xlu1 %v420_v48, %s1278_s23 }
 0x137   : > { %468 = vrot.lane.b32.xlu0 %v417_v36, %s1283_s10  ;;  %581 = vrot.lane.b32.xlu1 %v420_v48, %s1280_s16 }
 0x13b   : > { %427 = vrot.lane.b32.xlu0 %v418_v44, %s1284_s12  ;;  %676 = vrot.lane.b32.xlu1 %v418_v44, %s1285_s25 }
 0x13f   : > { %435 = vrot.lane.b32.xlu0 %v417_v36, %s1284_s12  ;;  %530 = vrot.lane.b32.xlu1 %v420_v48, %s1281_s24 }
 0x143   : > { %674 = vrot.lane.b32.xlu0 %v417_v36, %s1285_s25  ;;  %497 = vrot.lane.b32.xlu1 %v420_v48, %s1282_s26  ;;  %v629_v36 = vsub.s32 6, %v1522_v29  ;;  %s992_s26 = scalar_lea.sflag [#allocation4], %s1433_s14 }
 0x145   : > { %v630_v44 = vrot.slane %v1528_v35, %v629_v36  ;;  %v634_v47 = vrot.slane %v1533_v40, %v629_v36 }
 0x147   : > { %678 = vrot.lane.b32.xlu0 %v419_v45, %s1285_s25  ;;  %464 = vrot.lane.b32.xlu1 %v420_v48, %s1283_s10 }
 0x14b   : > { %713 = vperm.xlu0 %1169, %v709_v55   ;;  %429 = vrot.lane.b32.xlu1 %v420_v48, %s1284_s12 }
 0x14f   : > { %800 = vperm.xlu0 %1169, %v790_v57   ;;  %680 = vrot.lane.b32.xlu1 %v420_v48, %s1285_s25  ;;  %v596_v48 = vsub.s32 5, %v1522_v29  ;;  %s1726_s25 = scalar_lea.vmem [#allocation5], %s1085_s22  ;;  %s1108_s22 = sshll.u32 %s1355_s9, 8 }
 0x150   : > { %s1005_s23 = sshll.u32 %s1726_s25, 4  ;;  %s1761_s24 = scalar_lea.hbm %s1817_s8, %s1108_s22  ;;  %s1763_s23 = int_to_ptr.vmem [resolvable:$true] %s1005_s23 }
 0x151   : > { %v601_v34 = vrot.slane %v1533_v40, %v596_v48  ;;  %s1207_s9 = scalar_lea.vmem %s1763_s23, 2048  ;;  %p1214_p5 = scmp.lt.s32.totalorder %s1763_s23, %s1212_s13 }
 0x152   : > { %p1208_p11 = scmp.ne.s32.totalorder %s1763_s23, %s1207_s9  ;;  %p1215_p7 = scmp.lt.s32.totalorder %s1213_s21, %s1207_s9 }
 0x153   : > { %810 = vperm.xlu0 %1169, %v792_v58   ;;  %718 = vperm.xlu1 %1170, %v710_v60  }
 0x154   : > { %p1209_p13 = pnand %p1208_p11, %p1828_p12  ;;  %p1216_p8 = por %p1215_p7, %p1214_p5 }
 0x156   : > { %p1210_p4 = pneg %p1209_p13 }
 0x157   : > { %820 = vperm.xlu0 %1169, %v794_v59   ;;  %805 = vperm.xlu1 %1170, %v791_v62  }
 0x158   : > { %p1217_p10 = pnand %p1216_p8, %p1210_p4 }
 0x15b   : > { %830 = vperm.xlu0 %1169, %v796_v61   ;;  %815 = vperm.xlu1 %1170, %v793_v63  }
 0x15f   : > { %825 = vperm.xlu1 %1170, %v795_v4  }
 0x163   : > { %835 = vperm.xlu1 %1170, %v797_v8  }
 0x181   : > { %v609_v9 = vpop.permute.xlu0 %608  ;;  %v642_v14 = vpop.permute.xlu1 %641 }
 0x185   : > { %v576_v17 = vpop.permute.xlu0 %575  ;;  %v644_v20 = vpop.permute.xlu1 %643 }
 0x186   : > { %v650_v42 = vsel %vm649_vm2, %v642_v14, %v644_v20  ;;  %v658_v43 = vsel %vm649_vm2, %v644_v20, %v642_v14  ;;  %v597_v20 = vrot.slane %v1528_v35, %v596_v48  ;;  %v549_v48 = vsub.s32 3, %v1522_v29 }
 0x187   : > { %v668_v57 = vmul.f32 %v663_v39, %v650_v42  ;;  %v669_v59 = vmul.f32 %v667_v41, %v658_v43 }
 0x189   : > { %v1599_v21 = vpop.permute.xlu0 %534  ;;  %v611_v24 = vpop.permute.xlu1 %610 }
 0x18a   : > { %v617_v61 = vsel %vm616_vm3, %v609_v9, %v611_v24  ;;  %v625_v62 = vsel %vm616_vm3, %v611_v24, %v609_v9 }
 0x18d   : > { %v1601_v25 = vpop.permute.xlu0 %501  ;;  %v578_v26 = vpop.permute.xlu1 %577 }
 0x18e   : > { %v584_v9 = vsel %vm583_vm4, %v576_v17, %v578_v26  ;;  %v592_v24 = vsel %vm583_vm4, %v578_v26, %v576_v17 }
 0x191   : > { %v1603_v27 = vpop.permute.xlu0 %528  ;;  %v1605_v28 = vpop.permute.xlu1 %536 }
 0x195   : > { %v1607_v30 = vpop.permute.xlu0 %495  ;;  %v1609_v31 = vpop.permute.xlu1 %503 }
 0x196   : > { %v506_v51 = vsel %vm505_vm6, %v1601_v25, %v1607_v30  ;;  %v512_v52 = vsel %vm505_vm6, %v1607_v30, %v1601_v25 }
 0x199   : > { %v646_v32 = vpop.permute.xlu0 %645  ;;  %v1611_v33 = vpop.permute.xlu1 %470 }
 0x19d   : > { %v613_v37 = vpop.permute.xlu0 %612  ;;  %v1615_v38 = vpop.permute.xlu1 %437 }
 0x1a1   : > { %v580_v45 = vpop.permute.xlu0 %579  ;;  %v648_v46 = vpop.permute.xlu1 %647 }
 0x1a2   : > { %v651_v55 = vsel %vm649_vm2, %v646_v32, %v648_v46  ;;  %v659_v56 = vsel %vm649_vm2, %v648_v46, %v646_v32 }
 0x1a3   : > { %v670_v58 = vmul.f32 %v663_v39, %v651_v55  ;;  %v671_v60 = vmul.f32 %v667_v41, %v659_v56  ;;  %v635_v39 = vmul.f32 %v630_v44, %v617_v61  ;;  %v636_v41 = vmul.f32 %v634_v47, %v625_v62 }
 0x1a4   : > { %v516_v62 = vsub.s32 2, %v1522_v29 }
 0x1a5   : > { %v1624_v63 = vpop.permute.xlu0 %462  ;;  %v615_v4 = vpop.permute.xlu1 %614  ;;  %v673_v8 = vpack.c.bf16 %v671_v60, %v669_v59  ;;  %v672_v14 = vpack.c.bf16 %v670_v58, %v668_v57  ;;  %v602_v59 = vmul.f32 %v597_v20, %v584_v9  ;;  %v603_v60 = vmul.f32 %v601_v34, %v592_v24 }
 0x1a6   : > { %v618_v32 = vsel %vm616_vm3, %v613_v37, %v615_v4  ;;  %v626_v36 = vsel %vm616_vm3, %v615_v4, %v613_v37  ;;  %v550_v4 = vrot.slane %v1528_v35, %v549_v48 }
 0x1a7   : > { %v637_v42 = vmul.f32 %v630_v44, %v618_v32  ;;  %v638_v43 = vmul.f32 %v634_v47, %v626_v36  ;;  %733 = vmatprep.subr.bf16.mxu1 %v673_v8  ;;  %v554_v8 = vrot.slane %v1533_v40, %v549_v48  ;;  %v517_v36 = vrot.slane %v1528_v35, %v516_v62 }
 0x1a8   : > { %734 = vmatpush1.bf16.msra.mxu1 %v672_v14  ;;  %v450_v48 = vsub.s32 0, %v1522_v29 }
 0x1a9   : > { %v469_v46 = vpop.permute.xlu0 %468  ;;  %v582_v55 = vpop.permute.xlu1 %581  ;;  %v640_v56 = vpack.c.bf16 %v638_v43, %v636_v41  ;;  %v639_v57 = vpack.c.bf16 %v637_v42, %v635_v39  ;;  %v521_v39 = vrot.slane %v1533_v40, %v516_v62  ;;  %v522_v30 = vmul.f32 %v517_v36, %v512_v52 }
 0x1aa   : > { %v585_v58 = vsel %vm583_vm4, %v580_v45, %v582_v55  ;;  %v593_v37 = vsel %vm583_vm4, %v582_v55, %v580_v45  ;;  %v539_v45 = vsel %vm538_vm5, %v1599_v21, %v1603_v27 }
 0x1ab   : > { %v604_v44 = vmul.f32 %v597_v20, %v585_v58  ;;  %v605_v47 = vmul.f32 %v601_v34, %v593_v37  ;;  %735 = vmatprep.subr.bf16.mxu1 %v640_v56  ;;  %v545_v20 = vsel %vm538_vm5, %v1603_v27, %v1599_v21  ;;  %v483_v34 = vsub.s32 1, %v1522_v29 }
 0x1ac   : > { %736 = vmatpush1.bf16.msra.mxu1 %v639_v57  ;;  %v555_v21 = vmul.f32 %v550_v4, %v545_v20  ;;  %v556_v27 = vmul.f32 %v554_v8, %v539_v45  ;;  %v523_v37 = vmul.f32 %v521_v39, %v506_v51 }
 0x1ad   : > { %v1635_v61 = vpop.permute.xlu1 %676  ;;  %v607_v17 = vpack.c.bf16 %v605_v47, %v603_v60  ;;  %v606_v26 = vpack.c.bf16 %v604_v44, %v602_v59  ;;  %v428_v14 = vpop.permute.xlu0 %427  ;;  %v488_v57 = vrot.slane %v1533_v40, %v483_v34  ;;  %v479_v59 = vsel %vm472_vm1, %v1624_v63, %v469_v46 }
 0x1ae   : > { %v451_v47 = vrot.slane %v1528_v35, %v450_v48 }
 0x1af   : > { %737 = vmatprep.subr.bf16.mxu1 %v607_v17 }
 0x1b0   : > { %738 = vmatpush1.bf16.msra.mxu1 %v606_v26 }
 0x1b1   : > { %739 = vmatprep.subr.bf16.mxu1 %v574_v54  ;;  %v531_v32 = vpop.permute.xlu1 %530  ;;  %v484_v54 = vrot.slane %v1528_v35, %v483_v34  ;;  %v436_v24 = vpop.permute.xlu0 %435 }
 0x1b2   : > { %v540_v41 = vsel %vm538_vm5, %v1605_v28, %v531_v32  ;;  %v546_v42 = vsel %vm538_vm5, %v531_v32, %v1605_v28  ;;  %v446_v20 = vsel %vm439_vm7, %v428_v14, %v436_v24 }
 0x1b3   : > { %v557_v43 = vmul.f32 %v550_v4, %v546_v42  ;;  %v558_v9 = vmul.f32 %v554_v8, %v540_v41  ;;  %v489_v62 = vmul.f32 %v484_v54, %v479_v59 }
 0x1b4   : > { %740 = vmatpush1.bf16.msra.mxu1 %v573_v53  ;;  %v473_v53 = vsel %vm472_vm1, %v469_v46, %v1624_v63  ;;  %v440_v46 = vsel %vm439_vm7, %v436_v24, %v428_v14  ;;  %v1089_v14 = vld [vmem:[%s1816_s7 + $0x10] ss:$0 sm:$0xff] }
 0x1b5   : > { %v498_v28 = vpop.permute.xlu1 %497  ;;  %v560_v55 = vpack.c.bf16 %v558_v9, %v556_v27  ;;  %v559_v56 = vpack.c.bf16 %v557_v43, %v555_v21  ;;  %v490_v4 = vmul.f32 %v488_v57, %v473_v53  ;;  %v675_v8 = vpop.permute.xlu0 %674  ;;  %v1090_v21 = vld [vmem:[%s1816_s7 + $0x18] ss:$0 sm:$0xff] }
 0x1b6   : > { %v507_v58 = vsel %vm505_vm6, %v1609_v31, %v498_v28  ;;  %v513_v25 = vsel %vm505_vm6, %v498_v28, %v1609_v31  ;;  %v455_v31 = vrot.slane %v1533_v40, %v450_v48  ;;  %v683_v27 = vsel %vm682_vm8, %v675_v8, %v1635_v61 }
 0x1b7   : > { %v524_v49 = vmul.f32 %v517_v36, %v513_v25  ;;  %v525_v50 = vmul.f32 %v521_v39, %v507_v58  ;;  %741 = vmatprep.subr.bf16.mxu1 %v560_v55  ;;  %v456_v36 = vmul.f32 %v451_v47, %v446_v20  ;;  %v691_v43 = vsel %vm682_vm8, %v1635_v61, %v675_v8  ;;  %v1172_v61 = vld [vmem:[%s1811_s2] ss:$8 sps:$4 sm:$0xff]  }
 0x1b8   : > { %742 = vmatpush1.bf16.msra.mxu1 %v559_v56  ;;  %v457_v39 = vmul.f32 %v455_v31, %v440_v46  ;;  %v701_v28 = vmul.f32 %v1089_v14, %v683_v27  ;;  %v702_v55 = vmul.f32 %v1090_v21, %v691_v43  ;;  %v1175_v8 = vld [vmem:[%s1812_s3] sm:$0xff]   ;;  %v1178_v46 = vld [vmem:[%s1812_s3 + $0x18] sm:$0xff]  }
 0x1b9   : > { %v465_v29 = vpop.permute.xlu1 %464  ;;  %v527_v60 = vpack.c.bf16 %v525_v50, %v523_v37  ;;  %v526_v44 = vpack.c.bf16 %v524_v49, %v522_v30 }
 0x1ba   : > { %v474_v17 = vsel %vm472_vm1, %v1611_v33, %v465_v29  ;;  %v480_v26 = vsel %vm472_vm1, %v465_v29, %v1611_v33 }
 0x1bb   : > { %v491_v45 = vmul.f32 %v484_v54, %v480_v26  ;;  %v492_v63 = vmul.f32 %v488_v57, %v474_v17  ;;  %743 = vmatprep.subr.bf16.mxu1 %v527_v60 }
 0x1bc   : > { %744 = vmatpush1.bf16.msra.mxu1 %v526_v44 }
 0x1bd   : > { %v430_v35 = vpop.permute.xlu1 %429  ;;  %v494_v40 = vpack.c.bf16 %v492_v63, %v490_v4  ;;  %v493_v34 = vpack.c.bf16 %v491_v45, %v489_v62  ;;  %v1176_v45 = vld [vmem:[%s1812_s3 + $0x8] sm:$0xff]   ;;  %v1177_v63 = vld [vmem:[%s1812_s3 + $0x10] sm:$0xff]  }
 0x1be   : > { %v441_v32 = vsel %vm439_vm7, %v1615_v38, %v430_v35  ;;  %v447_v33 = vsel %vm439_vm7, %v430_v35, %v1615_v38  ;;  %v679_v38 = vpop.permute.xlu0 %678 }
 0x1bf   : > { %v458_v41 = vmul.f32 %v451_v47, %v447_v33  ;;  %v459_v42 = vmul.f32 %v455_v31, %v441_v32  ;;  %745 = vmatprep.subr.bf16.mxu1 %v494_v40 }
 0x1c0   : > { %746 = vmatpush1.bf16.msra.mxu1 %v493_v34 }
 0x1c1   : > { %v681_v9 = vpop.permute.xlu1 %680  ;;  %v461_v51 = vpack.c.bf16 %v459_v42, %v457_v39  ;;  %v460_v52 = vpack.c.bf16 %v458_v41, %v456_v36 }
 0x1c2   : > { %v684_v54 = vsel %vm682_vm8, %v679_v38, %v681_v9  ;;  %v692_v24 = vsel %vm682_vm8, %v681_v9, %v679_v38 }
 0x1c3   : > { %v703_v56 = vmul.f32 %v1089_v14, %v684_v54  ;;  %v704_v57 = vmul.f32 %v1090_v21, %v692_v24  ;;  %747 = vmatprep.subr.bf16.mxu1 %v461_v51 }
 0x1c4   : > { %748 = vmatpush1.bf16.msra.mxu1 %v460_v52 }
 0x1c5   : > { %v706_v48 = vpack.c.bf16 %v704_v57, %v702_v55  ;;  %v705_v58 = vpack.c.bf16 %v703_v56, %v701_v28 }
 0x1c6   : > { %v714_v37 = vpop.permute.xlu0 %713 }
 0x1c7   : > { %763 = vmatprep.subr.bf16.mxu1 %v706_v48 }
 0x1c8   : > { %764 = vmatpush2.bf16.msra.mxu1 %v705_v58 }
 0x1ca   : > { %v801_v20 = vpop.permute.xlu0 %800 }
 0x1cb   : > { %766 = vmatmul.mubr.bf16.vlgmr.msra.gmra.mxu1 %v1172_v61 }
 0x1ce   : > { %v719_v49 = vpop.permute.xlu1 %718  ;;  %v811_v43 = vpop.permute.xlu0 %810 }
 0x1d2   : > { %v806_v36 = vpop.permute.xlu1 %805 }
 0x1d6   : > { %v816_v55 = vpop.permute.xlu1 %815 }
 0x28b   : > { %v767_v25 = vpop.f32.mrf.mxu1 }
 0x28c   : > { %v768_v29 = vadd.f32 %v767_v25, %v714_v37 }
 0x28d   : > { %v769_v30 = vpop.f32.mrf.mxu1 }
 0x28e   : > { %v770_v53 = vadd.f32 %v769_v30, %v714_v37  ;;  %v776_v26 = vmax.f32 %v768_v29, 0.0  ;;  %v821_v30 = vpop.permute.xlu0 %820 }
 0x28f   : > { %v771_v50 = vpop.f32.mrf.mxu1 }
 0x290   : > { %v772_v59 = vadd.f32 %v771_v50, %v719_v49  ;;  %v777_v31 = vmax.f32 %v770_v53, 0.0 }
 0x291   : > { %v773_v60 = vpop.f32.mrf.mxu1 }
 0x292   : > { %v774_v44 = vadd.f32 %v773_v60, %v719_v49  ;;  %v778_v47 = vmax.f32 %v772_v59, 0.0  ;;  %v826_v60 = vpop.permute.xlu1 %825 }
 0x294   : > { %v779_v17 = vmax.f32 %v774_v44, 0.0  ;;  %v788_v4 = vpack.c.bf16 %v778_v47, %v776_v26 }
 0x296   : > { %v789_v62 = vpack.c.bf16 %v779_v17, %v777_v31 }
 0x298   : > { %884 = vmatprep.subr.bf16.mxu0 %v789_v62 }
 0x299   : > { %885 = vmatpush1.bf16.msra.mxu0 %v788_v4  ;;  %v831_v4 = vpop.permute.xlu0 %830 }
 0x29c   : > { %1098 = vmatmul.mubr.msk.bf16.vlgmr.msra.gmra.mxu0 %vm472_vm1, %v1175_v8 }
 0x29d   : > { %912 = vmatprep.mubr.bf16.mxu0 %v1277_v0 }
 0x2a4   : > { %1099 = vmatmul.mubr.msk.bf16.gmra.mxu0 %vm472_vm1, %v1176_v45 }
 0x2a5   : > { %922 = vmatprep.mubr.bf16.mxu0 %v1277_v0 }
 0x2ac   : > { %1100 = vmatmul.mubr.msk.bf16.gmra.mxu0 %vm472_vm1, %v1177_v63 }
 0x2ad   : > { %932 = vmatprep.mubr.bf16.mxu0 %v1277_v0 }
 0x2b4   : > { %1101 = vmatmul.mubr.msk.bf16.gmra.mxu0 %vm472_vm1, %v1178_v46 }
 0x35c   : > { %v904_v35 = vpop.f32.mrf.mxu0 }
 0x35d   : > { %v905_v40 = vadd.f32 %v904_v35, %v801_v20 }
 0x35e   : > { %v906_v34 = vpop.f32.mrf.mxu0 }
 0x35f   : > { %v943_v32 = vadd.f32 %v905_v40, %v1507_v22  ;;  %v907_v33 = vadd.f32 %v906_v34, %v801_v20  ;;  %v836_v40 = vpop.permute.xlu1 %835 }
 0x360   : > { %v908_v39 = vpop.f32.mrf.mxu0 }
 0x361   : > { %v959_v41 = vmax.f32 %v943_v32, 0.0  ;;  %v944_v42 = vadd.f32 %v907_v33, %v1495_v18  ;;  %v909_v14 = vadd.f32 %v908_v39, %v806_v36 }
 0x362   : > { %v910_v0 = vpop.f32.mrf.mxu0 }
 0x363   : > { %975 = vst [vmem:[%s1726_s25] sm:$0xff] %v959_v41  ;;  %v960_v21 = vmax.f32 %v944_v42, 0.0  ;;  %v945_v27 = vadd.f32 %v909_v14, %v1510_v23  ;;  %v911_v22 = vadd.f32 %v910_v0, %v806_v36 }
 0x364   : > { %v914_v38 = vpop.f32.mrf.mxu0 }
 0x365   : > { %976 = vst [vmem:[%s1726_s25 + $0x8] sm:$0xff] %v960_v21  ;;  %v961_v9 = vmax.f32 %v945_v27, 0.0  ;;  %v946_v18 = vadd.f32 %v911_v22, %v1498_v19  ;;  %v915_v51 = vadd.f32 %v914_v38, %v811_v43 }
 0x366   : > { %v916_v52 = vpop.f32.mrf.mxu0 }
 0x367   : > { %977 = vst [vmem:[%s1726_s25 + $0x10] sm:$0xff] %v961_v9  ;;  %v962_v54 = vmax.f32 %v946_v18, 0.0  ;;  %v947_v24 = vadd.f32 %v915_v51, %v1487_v15  ;;  %v917_v28 = vadd.f32 %v916_v52, %v811_v43 }
 0x368   : > { %v918_v56 = vpop.f32.mrf.mxu0 }
 0x369   : > { %978 = vst [vmem:[%s1726_s25 + $0x18] sm:$0xff] %v962_v54  ;;  %v963_v23 = vmax.f32 %v947_v24, 0.0  ;;  %v948_v57 = vadd.f32 %v917_v28, %v1479_v12  ;;  %v919_v48 = vadd.f32 %v918_v56, %v816_v55 }
 0x36a   : > { %v920_v58 = vpop.f32.mrf.mxu0 }
 0x36b   : > { %979 = vst [vmem:[%s1726_s25 + $0x20] sm:$0xff] %v963_v23  ;;  %v964_v61 = vmax.f32 %v948_v57, 0.0  ;;  %v949_v19 = vadd.f32 %v919_v48, %v1490_v16  ;;  %v921_v25 = vadd.f32 %v920_v58, %v816_v55 }
 0x36c   : > { %v924_v37 = vpop.f32.mrf.mxu0 }
 0x36d   : > { %980 = vst [vmem:[%s1726_s25 + $0x28] sm:$0xff] %v964_v61  ;;  %v965_v15 = vmax.f32 %v949_v19, 0.0  ;;  %v950_v49 = vadd.f32 %v921_v25, %v1482_v13  ;;  %v925_v50 = vadd.f32 %v924_v37, %v821_v30 }
 0x36e   : > { %v926_v53 = vpop.f32.mrf.mxu0 }
 0x36f   : > { %981 = vst [vmem:[%s1726_s25 + $0x30] sm:$0xff] %v965_v15  ;;  %v966_v59 = vmax.f32 %v950_v49, 0.0  ;;  %v951_v12 = vadd.f32 %v925_v50, %v1473_v10  ;;  %v927_v29 = vadd.f32 %v926_v53, %v821_v30 }
 0x370   : > { %v928_v44 = vpop.f32.mrf.mxu0 }
 0x371   : > { %982 = vst [vmem:[%s1726_s25 + $0x38] sm:$0xff] %v966_v59  ;;  %v967_v16 = vmax.f32 %v951_v12, 0.0  ;;  %v952_v47 = vadd.f32 %v927_v29, %v1463_v6  ;;  %v929_v31 = vadd.f32 %v928_v44, %v826_v60 }
 0x372   : > { %v930_v17 = vpop.f32.mrf.mxu0 }
 0x373   : > { %983 = vst [vmem:[%s1726_s25 + $0x40] sm:$0xff] %v967_v16  ;;  %v968_v26 = vmax.f32 %v952_v47, 0.0  ;;  %v953_v13 = vadd.f32 %v929_v31, %v1476_v11  ;;  %v931_v62 = vadd.f32 %v930_v17, %v826_v60 }
 0x374   : > { %v934_v8 = vpop.f32.mrf.mxu0 }
 0x375   : > { %984 = vst [vmem:[%s1726_s25 + $0x48] sm:$0xff] %v968_v26  ;;  %v969_v10 = vmax.f32 %v953_v13, 0.0  ;;  %v954_v45 = vadd.f32 %v931_v62, %v1466_v7  ;;  %v935_v63 = vadd.f32 %v934_v8, %v831_v4 }
 0x376   : > { %v936_v46 = vpop.f32.mrf.mxu0 }
 0x377   : > { %985 = vst [vmem:[%s1726_s25 + $0x50] sm:$0xff] %v969_v10  ;;  %v970_v6 = vmax.f32 %v954_v45, 0.0  ;;  %v955_v20 = vadd.f32 %v935_v63, %v1455_v3  ;;  %v937_v35 = vadd.f32 %v936_v46, %v831_v4 }
 0x378   : > { %v938_v11 = vpop.f32.mrf.mxu0 }
 0x379   : > { %986 = vst [vmem:[%s1726_s25 + $0x58] sm:$0xff] %v970_v6  ;;  %v971_v34 = vmax.f32 %v955_v20, 0.0  ;;  %v956_v32 = vadd.f32 %v937_v35, %v1449_v1  ;;  %v939_v33 = vadd.f32 %v938_v11, %v836_v40 }
 0x37a   : > { %v940_v7 = vpop.f32.mrf.mxu0 }
 0x37b   : > { %987 = vst [vmem:[%s1726_s25 + $0x60] sm:$0xff] %v971_v34  ;;  %v972_v36 = vmax.f32 %v956_v32, 0.0  ;;  %v957_v39 = vadd.f32 %v939_v33, %v1460_v5  ;;  %v941_v41 = vadd.f32 %v940_v7, %v836_v40 }
 0x37d   : > { %988 = vst [vmem:[%s1726_s25 + $0x68] sm:$0xff] %v972_v36  ;;  %v973_v3 = vmax.f32 %v957_v39, 0.0  ;;  %v958_v42 = vadd.f32 %v941_v41, %v1452_v2 }
 0x37f   : > { %989 = vst [vmem:[%s1726_s25 + $0x70] sm:$0xff] %v973_v3  ;;  %v974_v1 = vmax.f32 %v958_v42, 0.0 }
 0x381   : > { %990 = vst [vmem:[%s1726_s25 + $0x78] sm:$0xff] %v974_v1 }
 0x382   : > { %1220 = shalt.err (!%p1217_p10)
}
 0x383   : > { %s1221_s12 = scalar_lea.hbm %s1761_s24, 2048  ;;  %s1225_s22 = scalar_lea.hbm %s1817_s8, 4096 }
 0x384   : > { %p1222_p1 = scmp.ne.s32.totalorder %s1761_s24, %s1221_s12  ;;  %p1226_p0 = scmp.lt.s32.totalorder %s1761_s24, %s1817_s8 }
 0x385   : > { %p1227_p2 = scmp.lt.s32.totalorder %s1225_s22, %s1221_s12 }
 0x386   : > { %p1223_p3 = pnand %p1222_p1, %p1828_p12 }
 0x387   : > { %p1228_p6 = por %p1227_p2, %p1226_p0 }
 0x388   : > { %p1224_p9 = pneg %p1223_p3 }
 0x38a   : > { %p1229_p11 = pnand %p1228_p6, %p1224_p9 }
 0x38c   : > { %1232 = shalt.err (!%p1229_p11)
}
 0x38d   : > { %s1287_s9 = smov 256   ;;  %s1288_s20 = smov 512  }
 0x38e   : > { %1111 = dma.vmem_to_hbm [thread:$0]  (%p1828_p12), %s1763_s23, 2048, %s1761_s24, %s992_s26, %s1287_s9, %s1288_s20, %s1283_s10  }
 0x38f PF: > { %s1020_s13 = sand.u32 1, %s1259_s27   ;;  %p1829_p13 = scmp.ne.s32.totalorder %s1824_s18, 0 }
 0x390   : > { %p1830_p4 = scmp.ge.s32.totalorder %s1271_s30, 2  ;;  %s1021_s21 = scalar_lea.sflag [#allocation4], %s1020_s13 }
 0x392   : > { %p1118_p5 = pnand %p1830_p4, %p1829_p13 }
 0x394   : > { %p1119_p7 = pneg %p1118_p5 }
 0x396   : > { %1254 = dma.done.wait (%p1119_p7), %s1021_s21, 2048  }
 0x397   : > { %1256 = vsyncadd (%p1119_p7), %s1021_s21, 4294965248  ;;  %s1831_s12 = sld [smem:[#allocation8_spill]]  ;;  %p21_p8 = scmp.ge.s32.totalorder %s1359_s11, 4  }
 0x398   : > { %s1832_s27 = smov %s1263_s28  ;;  %s1833_s28 = smov %s1267_s29 }
 0x399   : > { %s1835_s30 = smov %s1359_s11  ;;  %23 = sbr.rel (!%p21_p8) target bundleno = 5 (0x5), region = 97 }
 0x39d   : > { %s1834_s29 = smov %s1831_s12 }
 0x39e   :  { %1026 = vsyncpa [#allocation3], 1 }
 0x39f   :  { %1028 = vsyncpa [#allocation3 + $0x1], 1 }
 0x3a0   :  { %1029 = vsyncpa [#allocation4], 1 }
 0x3a1   :  { %1031 = vsyncpa [#allocation4 + $0x1], 1 }

</bundles_post_ra>
